<compile_context>
chip_gen: v5e
topology: v5e:2x2
jax: 0.10.0
libtpu: 0.0.40
codegen_flags: <defaults>
</compile_context>

<pallas_src>
import math

import jax
import jax.numpy as jnp
from jax.experimental import pallas as pl
from jax.experimental.pallas import tpu as pltpu


def shifting_tanh_kernel(x_ref, a_ref, b_ref, o_ref):
    # VPU sub/mul + EUP tanh; (1, C) params broadcast over the (R, C) tile.
    x = x_ref[...].astype(jnp.float32)
    a = a_ref[...].astype(jnp.float32)
    b = b_ref[...].astype(jnp.float32)
    o_ref[...] = jnp.tanh(a * (x - b)).astype(o_ref.dtype)


def _sublane_multiple(dtype):
    """Native sublane packing multiple: 8 (f32), 16 (bf16), 32 (int8/fp8)."""
    itemsize = jnp.dtype(dtype).itemsize
    return max(8, 32 // max(1, itemsize))


def _row_pack_factor(n_cols):
    """Smallest k>1 with (k*n_cols) % 128 == 0, else 1 (already lane-dense)."""
    if n_cols % 128 == 0:
        return 1
    return 128 // math.gcd(n_cols, 128)


def _tpu_defaults():
    """Generation-aware block / VMEM budgets."""
    is_v7 = False
    try:
        is_v7 = "v7" in jax.devices()[0].device_kind.lower()
    except Exception:
        pass
    try:
        vmem_cap = int(pltpu.get_tpu_info().vmem_capacity_bytes)
    except Exception:
        vmem_cap = (64 << 20) if is_v7 else (128 << 20)
    if is_v7 or vmem_cap <= (64 << 20):
        # v7x-class: 64 MiB VMEM/TC, 2 TCs, ~3.2 TB/s HBM.
        return dict(target_block_bytes=8 << 20, vmem_limit_bytes=48 << 20, num_tc=2)
    # v5e/v6e-class: 128 MiB VMEM, single TensorCore.
    return dict(target_block_bytes=16 << 20, vmem_limit_bytes=96 << 20, num_tc=1)


def _choose_tiles(n_rows, n_cols, itemsize, sub, target_block_bytes,
                  vmem_limit_bytes, num_tc):
    """Pick (tile_rows, tile_cols): big blocks, VMEM-safe, sublane/lane aligned."""
    # Double-buffered input + output = 4 blocks must fit the scoped limit.
    max_block_bytes = max(sub * 128 * itemsize,
                          min(target_block_bytes, vmem_limit_bytes // 5))

    # Lane (column) tile: full F unless even a min-row full-F block is too big.
    if n_cols <= 128 or sub * n_cols * itemsize <= max_block_bytes:
        tile_cols = n_cols
    else:
        tile_cols = min(
            n_cols,
            max(128, ((max_block_bytes // (sub * itemsize)) // 128) * 128))

    # Row tile: as many sublane-multiple rows as fit the byte budget.
    tile_rows = max(sub, ((max_block_bytes // (tile_cols * itemsize)) // sub) * sub)

    # Megacore (v7x): keep >=4 grid steps per TensorCore so each core pipelines.
    if num_tc > 1:
        want_steps = 4 * num_tc
        steps = pl.cdiv(n_rows, tile_rows) * pl.cdiv(n_cols, tile_cols)
        if steps < want_steps and n_rows >= want_steps * sub:
            per_step = pl.cdiv(n_rows, want_steps)
            tile_rows = max(sub, (per_step // sub) * sub)

    if tile_rows >= n_rows:
        tile_rows = n_rows  # full row extent (legal even if not sublane-multiple)
    return tile_rows, tile_cols


def _shifting_tanh_call(x, a, b, *, target_block_bytes, vmem_limit_bytes, num_tc):
    """One pallas_call over a (N, F) input with (1, F) params."""
    N, F = x.shape
    sub = _sublane_multiple(x.dtype)
    itemsize = jnp.dtype(x.dtype).itemsize
    tile_rows, tile_cols = _choose_tiles(
        N, F, itemsize, sub, target_block_bytes, vmem_limit_bytes, num_tc)
    grid = (pl.cdiv(N, tile_rows), pl.cdiv(F, tile_cols))

    return pl.pallas_call(
        shifting_tanh_kernel,
        out_shape=jax.ShapeDtypeStruct((N, F), x.dtype),
        grid_spec=pltpu.PrefetchScalarGridSpec(
            num_scalar_prefetch=0,
            grid=grid,
            in_specs=[
                pl.BlockSpec((tile_rows, tile_cols), lambda i, j: (i, j)),  # x
                pl.BlockSpec((1, tile_cols), lambda i, j: (0, j)),          # a
                pl.BlockSpec((1, tile_cols), lambda i, j: (0, j)),          # b
            ],
            out_specs=pl.BlockSpec((tile_rows, tile_cols), lambda i, j: (i, j)),
        ),
        compiler_params=pltpu.CompilerParams(
            dimension_semantics=("parallel", "parallel"),
            vmem_limit_bytes=vmem_limit_bytes,
        ),
    )(x, a, b)


def shifting_tanh(x, a, b, *, target_block_bytes=None, vmem_limit_bytes=None):
    """x: (N, F), a/b: (1, F) -> tanh(a * (x - b)), shape (N, F)."""
    N, F = x.shape
    assert a.shape == (1, F) and b.shape == (1, F)

    defaults = _tpu_defaults()
    if target_block_bytes is None:
        target_block_bytes = defaults["target_block_bytes"]
    if vmem_limit_bytes is None:
        vmem_limit_bytes = defaults["vmem_limit_bytes"]
    num_tc = defaults["num_tc"]
    kw = dict(target_block_bytes=target_block_bytes,
              vmem_limit_bytes=vmem_limit_bytes, num_tc=num_tc)

    # Lane-dense packing for F % 128 != 0: fold k consecutive rows into the
    # lane axis (pure layout plumbing; a/b tile exactly per F columns).
    k = _row_pack_factor(F)
    n_body = (N // k) * k if k > 1 else 0
    if k <= 1 or n_body == 0:
        return _shifting_tanh_call(x, a, b, **kw)

    ap = jnp.tile(a, (1, k))
    bp = jnp.tile(b, (1, k))
    xb = x[:n_body].reshape(n_body // k, k * F)
    yb = _shifting_tanh_call(xb, ap, bp, **kw).reshape(n_body, F)
    if n_body == N:
        return yb
    # Small row remainder (< k rows): second tiny call, unpacked. The body
    # keeps its 128-lane-dense stores.
    yt = _shifting_tanh_call(x[n_body:], a, b, **kw)
    return jnp.concatenate([yb, yt], axis=0)


if __name__ == "__main__":
    key = jax.random.PRNGKey(0)
    kx, ka, kb, kx2 = jax.random.split(key, 4)

    # Small demo shapes consistent with the module: x (batch, size), a/b (1, size).
    batch, size = 8, 32
    x = jax.random.normal(kx, (batch, size), dtype=jnp.float32)

    # Learnable params (module inits a=ones, b=zeros); use deterministic
    # non-trivial values to exercise the broadcast + shift/scale path.
    a = 1.0 + 0.1 * jax.random.normal(ka, (1, size), dtype=jnp.float32)
    b = 0.1 * jax.random.normal(kb, (1, size), dtype=jnp.float32)

    y = shifting_tanh(x, a, b)
    y = jax.block_until_ready(y)

    # Reference: plain JAX semantics of torch.tanh(a * (x - b)).
    y_ref = jnp.tanh(a * (x - b))
    assert y.shape == (batch, size)
    assert jnp.allclose(y, y_ref, atol=1e-5, rtol=1e-5)

    # Also exercise the non-divisible-batch path (packed body + tiny remainder).
    x2 = jax.random.normal(kx2, (10, size), dtype=jnp.float32)
    y2 = jax.block_until_ready(shifting_tanh(x2, a, b))
    assert jnp.allclose(y2, jnp.tanh(a * (x2 - b)), atol=1e-5, rtol=1e-5)

    print("KERNEL_OK")
</pallas_src>

<mosaic_0001>
module attributes {stable_mosaic.version = 11 : i64} {
  func.func @shifting_tanh_kernel(%arg0: i32, %arg1: i32, %arg2: memref<2x128xf32, #tpu.memory_space<vmem>>, %arg3: memref<1x128xf32, #tpu.memory_space<vmem>>, %arg4: memref<1x128xf32, #tpu.memory_space<vmem>>, %arg5: memref<2x128xf32, #tpu.memory_space<vmem>>) attributes {dimension_semantics = [#tpu.dimension_semantics<parallel>, #tpu.dimension_semantics<parallel>], iteration_bounds = array<i64: 1, 1>, scalar_prefetch = 0 : i64, scratch_operands = 0 : i64, tpu.core_type = #tpu.core_type<tc>, window_params = [{transform_indices = @transform_0, window_bounds = array<i64: 2, 128>}, {transform_indices = @transform_1, window_bounds = array<i64: 1, 128>}, {transform_indices = @transform_2, window_bounds = array<i64: 1, 128>}, {transform_indices = @transform_3, window_bounds = array<i64: 2, 128>}]} {
    %c0 = arith.constant 0 : index
    %c0_0 = arith.constant 0 : index
    %0 = vector.load %arg2[%c0, %c0_0] : memref<2x128xf32, #tpu.memory_space<vmem>>, vector<2x128xf32>
    %c0_1 = arith.constant 0 : index
    %c0_2 = arith.constant 0 : index
    %1 = vector.load %arg3[%c0_1, %c0_2] : memref<1x128xf32, #tpu.memory_space<vmem>>, vector<1x128xf32>
    %c0_3 = arith.constant 0 : index
    %c0_4 = arith.constant 0 : index
    %2 = vector.load %arg4[%c0_3, %c0_4] : memref<1x128xf32, #tpu.memory_space<vmem>>, vector<1x128xf32>
    %3 = vector.broadcast %2 : vector<1x128xf32> to vector<2x128xf32>
    %4 = arith.subf %0, %3 : vector<2x128xf32>
    %5 = vector.broadcast %1 : vector<1x128xf32> to vector<2x128xf32>
    %6 = arith.mulf %5, %4 : vector<2x128xf32>
    %7 = math.tanh %6 : vector<2x128xf32>
    %c0_5 = arith.constant 0 : index
    %c0_6 = arith.constant 0 : index
    %8 = vector.load %arg5[%c0_5, %c0_6] : memref<2x128xf32, #tpu.memory_space<vmem>>, vector<2x128xf32>
    tpu.vector_store %arg5[%c0_5, %c0_6], %7 {strides = array<i32>} : memref<2x128xf32, #tpu.memory_space<vmem>>, vector<2x128xf32>,
    return
  }
  func.func @transform_0(%arg0: i32, %arg1: i32) -> (i32, i32) {
    %c0_i32 = arith.constant 0 : i32
    return %arg0, %arg1 : i32, i32
  }
  func.func @transform_1(%arg0: i32, %arg1: i32) -> (i32, i32) {
    %c0_i32 = arith.constant 0 : i32
    %c0_i32_0 = arith.constant 0 : i32
    return %c0_i32, %arg1 : i32, i32
  }
  func.func @transform_2(%arg0: i32, %arg1: i32) -> (i32, i32) {
    %c0_i32 = arith.constant 0 : i32
    %c0_i32_0 = arith.constant 0 : i32
    return %c0_i32, %arg1 : i32, i32
  }
  func.func @transform_3(%arg0: i32, %arg1: i32) -> (i32, i32) {
    %c0_i32 = arith.constant 0 : i32
    return %arg0, %arg1 : i32, i32
  }
}

</mosaic_0001>

<bundles_post_ra>
// kernel: tpu_custom_call.1
= control target key start
LH: loop header
LB: loop body
LE: loop exit
PB: predicated region body
PF: predicated region fallthrough
CT: control target
= control target key end

     0   :  { %8 = vsyncpa [#allocation3], 0  ;;  %s194_s0 = inlined_call_operand.hbm [shape: f32[2,128], index: 0, kind: input, shape index: {}]   ;;  %s195_s1 = inlined_call_operand.hbm [shape: f32[1,128], index: 1, kind: input, shape index: {}]   ;;  %s196_s2 = inlined_call_operand.vmem [shape: f32[1,128], index: 2, kind: input, shape index: {}]   ;;  %s197_s3 = inlined_call_operand.hbm [shape: f32[2,128], index: 3, kind: output, shape index: {}]  }
   0x1   :  { %9 = vsyncpa [#allocation6], 0 }
   0x2   :  { %10 = vsyncpa [#allocation4], 0  ;;  %s16_s14 = sshll.u32 %s194_s0, 4  ;;  %s159_s15 = smov [#allocation2]   ;;  %s17_s14 = int_to_ptr.hbm [resolvable:$true] %s16_s14 }
   0x3   :  { %s18_s16 = sshll.u32 %s159_s15, 4  ;;  %s27_s19 = sshll.u32 %s195_s1, 4  ;;  %s19_s16 = int_to_ptr.vmem [resolvable:$true] %s18_s16  ;;  %s28_s19 = int_to_ptr.hbm [resolvable:$true] %s27_s19 }
   0x4   :  { %21 = dma.hbm_to_vmem [thread:$0]  %s17_s14, 32, %s19_s16, [#allocation3]  }
   0x5   :  { %s160_s20 = smov [#allocation5]  }
   0x6   :  { %s29_s21 = sshll.u32 %s160_s20, 4  ;;  %s30_s21 = int_to_ptr.vmem [resolvable:$true] %s29_s21 }
   0x7   :  { %32 = dma.hbm_to_vmem [thread:$0]  %s28_s19, 16, %s30_s21, [#allocation6]  }
   0x8   :  { %153 = dma.done.wait [#allocation3], 32  }
   0x9   :  { %154 = vsyncadd [#allocation3], 4294967264 }
   0xa   :  { %155 = dma.done.wait [#allocation6], 16  }
   0xb   :  { %156 = vsyncadd [#allocation6], 4294967280  ;;  %v43_v0 = vld [vmem:[#allocation2] sm:$0x3]  ;;  %v78_v2 = vld [vmem:[#allocation5] ss:$0 sm:$0xff] }
   0xc   :  { %v77_v1 = vld [vmem:[%s196_s2] ss:$0 sm:$0xff]  ;;  %s161_s1 = smov [#allocation7]   ;;  %s63_s26 = sshll.u32 %s197_s3, 4  ;;  %s64_s26 = int_to_ptr.hbm [resolvable:$true] %s63_s26 }
   0xd   :  { %v49_v3 = vsub.f32 %v43_v0, %v77_v1  ;;  %s61_s23 = sshll.u32 %s161_s1, 4  ;;  %s62_s23 = int_to_ptr.vmem [resolvable:$true] %s61_s23 }
   0xf   :  { %v53_v4 = vmul.f32 %v78_v2, %v49_v3 }
  0x11   :  { %79 = vtanh.f32 %v53_v4 }
  0x17   :  { %v80_v5 = vpop.eup %79 }
  0x18   :  { %55 = vst [vmem:[#allocation7] sm:$0x3] %v80_v5 }
  0x19   :  { %66 = dma.vmem_to_hbm [thread:$0]  %s62_s23, 32, %s64_s26, [#allocation4]  }
  0x1a   :  { %157 = dma.done.wait [#allocation4], 32  }
  0x1b   :  { %158 = vsyncadd [#allocation4], 4294967264 }
  0x1c   :  { %71 = vsyncpa [#allocation3], 1 }
  0x1d   :  { %72 = vsyncpa [#allocation6], 1 }
  0x1e   :  { %73 = vsyncpa [#allocation4], 1 }

</bundles_post_ra>
